<compile_context>
chip_gen: v7x
topology: tpu7x:2x2x1
jax: 0.10.0
libtpu: 0.0.40
codegen_flags: <defaults>
</compile_context>

<pallas_src>
import jax
import jax.numpy as jnp
from jax.experimental import pallas as pl
from jax.experimental.pallas import tpu as pltpu

LN_EPS = 1e-5  # torch.nn.LayerNorm default eps


def _round_up(a, b):
    return (a + b - 1) // b * b


def _cdiv(a, b):
    return (a + b - 1) // b


# ----------------------------------------------------------------------------
# Pallas kernel: fused  W @ [x ; t]  ->  ReLU  ->  LayerNorm over channels
# Block layout (lane-dense): activations/outputs are (C, tm), tm % 128 == 0.
# ----------------------------------------------------------------------------
def _fused_fc_relu_ln_kernel(x_ref, t_ref, w_ref, g_ref, b_ref, o_ref):
    # x_ref/t_ref: (C, tm)   w_ref: (C, 2C)   g_ref/b_ref: (C, 1)   o_ref: (C, tm)
    # Stack the two feature maps along channels so the Linear(cat[x,t]) becomes
    # a single K=2C MXU accumulation (no materialized concat in HBM, no extra
    # full-tile f32 VPU add).
    xt = jnp.concatenate([x_ref[...], t_ref[...]], axis=0)            # (2C, tm)
    h = jnp.dot(w_ref[...], xt, preferred_element_type=jnp.float32)   # (C, tm) f32
    h = jnp.maximum(h, 0.0)                                            # ReLU

    # Single-pass LayerNorm statistics over the channel (sublane) axis, f32.
    mean = jnp.mean(h, axis=0, keepdims=True)                          # (1, tm)
    meansq = jnp.mean(h * h, axis=0, keepdims=True)                    # (1, tm)
    var = jnp.maximum(meansq - mean * mean, 0.0)                       # biased var
    inv = jax.lax.rsqrt(var + LN_EPS)

    out = (h - mean) * inv * g_ref[...] + b_ref[...]
    o_ref[...] = out.astype(o_ref.dtype)


def fused_fc_relu_ln(x3, t3, w, gamma, beta, *, tm=2048):
    """x3, t3: (B, C, N);  w: (C, 2C);  gamma, beta: (C, 1)  ->  (B, C, N).

    Computes LayerNorm(ReLU(W @ cat[x, t])) in a channels-leading, lane-dense
    layout (LN reduces over the channel axis of each (C, tm) block).  Ragged N
    is handled by Pallas edge-block masking — no pad/slice HBM copies.
    """
    B, C, N = x3.shape

    # Lane-dense tile: multiple of 128, capped by the (128-rounded) extent.
    tm = min(tm, _round_up(N, 128))
    tm = max(128, _round_up(tm, 128))
    # Keep both TensorCores busy on tiny inputs (v7x: 2 TCs per chip).
    if B * _cdiv(N, tm) < 2 and N > 128:
        tm = _round_up(_cdiv(N, 2), 128)

    grid = (B, _cdiv(N, tm))

    return pl.pallas_call(
        _fused_fc_relu_ln_kernel,
        out_shape=jax.ShapeDtypeStruct((B, C, N), x3.dtype),
        grid_spec=pltpu.PrefetchScalarGridSpec(
            num_scalar_prefetch=0,
            grid=grid,
            in_specs=[
                # activations, NCHW-native: (C, tm) blocks, batch dim squeezed.
                pl.BlockSpec((None, C, tm), lambda b, m: (b, 0, m)),
                pl.BlockSpec((None, C, tm), lambda b, m: (b, 0, m)),
                # full fc weight, resident across the grid.
                pl.BlockSpec((C, 2 * C), lambda b, m: (0, 0)),
                # LayerNorm affine params (f32), broadcast along lanes.
                pl.BlockSpec((C, 1), lambda b, m: (0, 0)),
                pl.BlockSpec((C, 1), lambda b, m: (0, 0)),
            ],
            out_specs=pl.BlockSpec((None, C, tm), lambda b, m: (b, 0, m)),
        ),
        compiler_params=pltpu.CompilerParams(
            dimension_semantics=("parallel", "parallel")),
    )(x3, t3, w, gamma, beta)


# ----------------------------------------------------------------------------
# FusionBlock parameters + forward (glue in plain JAX; only free reshapes)
# ----------------------------------------------------------------------------
def init_fusion_block_params(key, channel):
    # nn.Linear(channel*2, channel, bias=False), xavier_uniform_ init.
    fan_in, fan_out = 2 * channel, channel
    limit = jnp.sqrt(6.0 / (fan_in + fan_out))
    w = jax.random.uniform(key, (fan_out, fan_in), jnp.float32, -limit, limit)
    return {
        "fc_w": w,                                        # (C, 2C) Linear weight
        "ln_g": jnp.ones((channel, 1), jnp.float32),      # LayerNorm weight (C,1)
        "ln_b": jnp.zeros((channel, 1), jnp.float32),     # LayerNorm bias   (C,1)
    }


def fusion_block_forward(params, x, t, task_index):
    B, C, H, W = x.shape
    N = H * W

    # TODO(synk): MultiTaskGeneralFusion(channel, r) source not provided; using
    #             z = 0 as a neutral placeholder for the residual branch.
    z = jnp.zeros_like(x)

    # NCHW-native: only metadata reshapes, no transposes / no concat in HBM.
    x3 = x.reshape(B, C, N)
    t3 = t.reshape(B, C, N)

    # Fused hot path (Pallas): Linear(cat) -> ReLU -> LayerNorm, lane-dense.
    # Weight follows the activation dtype (bf16 I/O halves HBM traffic; the
    # kernel keeps f32 MXU accumulation + f32 LN statistics either way).
    w = params["fc_w"].astype(x3.dtype)
    y = fused_fc_relu_ln(x3, t3, w, params["ln_g"], params["ln_b"])

    # TODO(synk): MMoE(channel, channel, 4, channel//2, noisy_gating=True, k=2)
    #             source not provided; identity routing + zero aux_loss placeholder.
    del task_index
    aux_loss = jnp.float32(0.0)

    y4 = y.reshape(B, C, H, W) + z
    return y4, aux_loss


# ----------------------------------------------------------------------------
def _reference(params, x, t):
    """Pure-JAX f32 reference mimicking the torch forward (to_3d/cat/fc/relu/LN)."""
    B, C, H, W = x.shape
    N = H * W
    x3 = jnp.transpose(x.reshape(B, C, N), (0, 2, 1)).reshape(B * N, C)
    t3 = jnp.transpose(t.reshape(B, C, N), (0, 2, 1)).reshape(B * N, C)
    h = jnp.concatenate([x3, t3], axis=-1) @ params["fc_w"].T
    h = jnp.maximum(h, 0.0)
    mu = h.mean(-1, keepdims=True)
    var = ((h - mu) ** 2).mean(-1, keepdims=True)
    h = (h - mu) * jax.lax.rsqrt(var + LN_EPS)
    h = h * params["ln_g"][:, 0] + params["ln_b"][:, 0]
    return jnp.transpose(h.reshape(B, N, C), (0, 2, 1)).reshape(B, C, H, W)


if __name__ == "__main__":
    key = jax.random.PRNGKey(0)
    kx, kt, kp = jax.random.split(key, 3)

    # Main case: B=2, channel=32, 16x16 spatial (N=256).
    B, C, H, W = 2, 32, 16, 16
    x = jax.random.normal(kx, (B, C, H, W), jnp.float32)
    t = jax.random.normal(kt, (B, C, H, W), jnp.float32)
    params = init_fusion_block_params(kp, C)

    y, aux_loss = fusion_block_forward(params, x, t, task_index=0)
    jax.block_until_ready((y, aux_loss))
    assert y.shape == (B, C, H, W)
    ref = _reference(params, x, t)
    assert jnp.allclose(y, ref, atol=1e-4, rtol=1e-4)

    # Ragged case: N = 7*9 = 63 -> exercises the masked edge block (no HBM pad).
    Hr, Wr = 7, 9
    xr = jax.random.normal(kx, (B, C, Hr, Wr), jnp.float32)
    tr = jax.random.normal(kt, (B, C, Hr, Wr), jnp.float32)
    yr, _ = fusion_block_forward(params, xr, tr, task_index=1)
    jax.block_until_ready(yr)
    assert yr.shape == (B, C, Hr, Wr)
    refr = _reference(params, xr, tr)
    assert jnp.allclose(yr, refr, atol=1e-4, rtol=1e-4)

    # bf16 I/O case: bf16 activations + weight, f32 accumulation inside.
    xb = x.astype(jnp.bfloat16)
    tb = t.astype(jnp.bfloat16)
    yb, _ = fusion_block_forward(params, xb, tb, task_index=2)
    jax.block_until_ready(yb)
    assert yb.dtype == jnp.bfloat16 and yb.shape == (B, C, H, W)
    params_q = dict(params)
    params_q["fc_w"] = params["fc_w"].astype(jnp.bfloat16).astype(jnp.float32)
    refb = _reference(params_q, xb.astype(jnp.float32), tb.astype(jnp.float32))
    assert jnp.allclose(yb.astype(jnp.float32), refb, atol=3e-2, rtol=3e-2)

    print("KERNEL_OK")
</pallas_src>

<mosaic_0001>
module attributes {stable_mosaic.version = 11 : i64} {
  func.func @_fused_fc_relu_ln_kernel(%arg0: i32, %arg1: i32, %arg2: memref<1x32x256xf32, #tpu.memory_space<vmem>>, %arg3: memref<1x32x256xf32, #tpu.memory_space<vmem>>, %arg4: memref<32x64xf32, #tpu.memory_space<vmem>>, %arg5: memref<32x1xf32, #tpu.memory_space<vmem>>, %arg6: memref<32x1xf32, #tpu.memory_space<vmem>>, %arg7: memref<1x32x256xf32, #tpu.memory_space<vmem>>) attributes {dimension_semantics = [#tpu.dimension_semantics<parallel>, #tpu.dimension_semantics<parallel>], iteration_bounds = array<i64: 2, 1>, scalar_prefetch = 0 : i64, scratch_operands = 0 : i64, tpu.core_type = #tpu.core_type<tc>, window_params = [{transform_indices = @transform_0, window_bounds = array<i64: 1, 32, 256>}, {transform_indices = @transform_1, window_bounds = array<i64: 1, 32, 256>}, {pipeline_mode = #tpu.pipeline_mode<synchronous>, transform_indices = @transform_2, window_bounds = array<i64: 32, 64>}, {pipeline_mode = #tpu.pipeline_mode<synchronous>, transform_indices = @transform_3, window_bounds = array<i64: 32, 1>}, {pipeline_mode = #tpu.pipeline_mode<synchronous>, transform_indices = @transform_4, window_bounds = array<i64: 32, 1>}, {transform_indices = @transform_5, window_bounds = array<i64: 1, 32, 256>}]} {
    %c0 = arith.constant 0 : index
    %c0_0 = arith.constant 0 : index
    %c0_1 = arith.constant 0 : index
    %0 = vector.load %arg2[%c0, %c0_0, %c0_1] : memref<1x32x256xf32, #tpu.memory_space<vmem>>, vector<1x32x256xf32>
    %1 = vector.shape_cast %0 : vector<1x32x256xf32> to vector<32x256xf32>
    %c0_2 = arith.constant 0 : index
    %c0_3 = arith.constant 0 : index
    %c0_4 = arith.constant 0 : index
    %2 = vector.load %arg3[%c0_2, %c0_3, %c0_4] : memref<1x32x256xf32, #tpu.memory_space<vmem>>, vector<1x32x256xf32>
    %3 = vector.shape_cast %2 : vector<1x32x256xf32> to vector<32x256xf32>
    %4 = tpu.concatenate %1, %3 in 0 : vector<32x256xf32>, vector<32x256xf32> -> vector<64x256xf32>
    %c0_5 = arith.constant 0 : index
    %c0_6 = arith.constant 0 : index
    %5 = vector.load %arg4[%c0_5, %c0_6] : memref<32x64xf32, #tpu.memory_space<vmem>>, vector<32x64xf32>
    %cst = arith.constant dense<0.000000e+00> : vector<32x256xf32>
    %6 = tpu.matmul %5, %4, %cst {dimension_numbers = #tpu.dot_dimension_numbers<[1], [0], [0], [1], [0, 0, 1, 1], [], []>} : vector<32x64xf32>, vector<64x256xf32>, vector<32x256xf32> -> vector<32x256xf32>
    %cst_7 = arith.constant 0.000000e+00 : f32
    %7 = vector.broadcast %cst_7 : f32 to vector<32x256xf32>
    %8 = arith.maximumf %6, %7 : vector<32x256xf32>
    %cst_8 = arith.constant dense<0.000000e+00> : vector<256xf32>
    %9 = vector.multi_reduction <add>, %8, %cst_8 [0] : vector<32x256xf32> to vector<256xf32>
    %10 = vector.shape_cast %9 : vector<256xf32> to vector<1x256xf32>
    %cst_9 = arith.constant 3.200000e+01 : f32
    %11 = vector.broadcast %cst_9 : f32 to vector<1x256xf32>
    %12 = arith.divf %10, %11 : vector<1x256xf32>
    %13 = arith.mulf %8, %8 : vector<32x256xf32>
    %cst_10 = arith.constant dense<0.000000e+00> : vector<256xf32>
    %14 = vector.multi_reduction <add>, %13, %cst_10 [0] : vector<32x256xf32> to vector<256xf32>
    %15 = vector.shape_cast %14 : vector<256xf32> to vector<1x256xf32>
    %cst_11 = arith.constant 3.200000e+01 : f32
    %16 = vector.broadcast %cst_11 : f32 to vector<1x256xf32>
    %17 = arith.divf %15, %16 : vector<1x256xf32>
    %18 = arith.mulf %12, %12 : vector<1x256xf32>
    %19 = arith.subf %17, %18 : vector<1x256xf32>
    %cst_12 = arith.constant 0.000000e+00 : f32
    %20 = vector.broadcast %cst_12 : f32 to vector<1x256xf32>
    %21 = arith.maximumf %19, %20 : vector<1x256xf32>
    %cst_13 = arith.constant 9.99999974E-6 : f32
    %22 = vector.broadcast %cst_13 : f32 to vector<1x256xf32>
    %23 = arith.addf %21, %22 : vector<1x256xf32>
    %24 = math.rsqrt %23 : vector<1x256xf32>
    %25 = vector.broadcast %12 : vector<1x256xf32> to vector<32x256xf32>
    %26 = arith.subf %8, %25 : vector<32x256xf32>
    %27 = vector.broadcast %24 : vector<1x256xf32> to vector<32x256xf32>
    %28 = arith.mulf %26, %27 : vector<32x256xf32>
    %c0_14 = arith.constant 0 : index
    %c0_15 = arith.constant 0 : index
    %29 = vector.load %arg5[%c0_14, %c0_15] : memref<32x1xf32, #tpu.memory_space<vmem>>, vector<32x1xf32>
    %30 = vector.broadcast %29 : vector<32x1xf32> to vector<32x256xf32>
    %31 = arith.mulf %28, %30 : vector<32x256xf32>
    %c0_16 = arith.constant 0 : index
    %c0_17 = arith.constant 0 : index
    %32 = vector.load %arg6[%c0_16, %c0_17] : memref<32x1xf32, #tpu.memory_space<vmem>>, vector<32x1xf32>
    %33 = vector.broadcast %32 : vector<32x1xf32> to vector<32x256xf32>
    %34 = arith.addf %31, %33 : vector<32x256xf32>
    %c0_18 = arith.constant 0 : index
    %c0_19 = arith.constant 0 : index
    %c0_20 = arith.constant 0 : index
    %35 = vector.load %arg7[%c0_18, %c0_19, %c0_20] : memref<1x32x256xf32, #tpu.memory_space<vmem>>, vector<1x32x256xf32>
    %36 = vector.shape_cast %35 : vector<1x32x256xf32> to vector<32x256xf32>
    %37 = vector.shape_cast %34 : vector<32x256xf32> to vector<1x32x256xf32>
    tpu.vector_store %arg7[%c0_18, %c0_19, %c0_20], %37 {strides = array<i32>} : memref<1x32x256xf32, #tpu.memory_space<vmem>>, vector<1x32x256xf32>,
    return
  }
  func.func @transform_0(%arg0: i32, %arg1: i32) -> (i32, i32, i32) {
    %c0_i32 = arith.constant 0 : i32
    %c0_i32_0 = arith.constant 0 : i32
    return %arg0, %c0_i32, %arg1 : i32, i32, i32
  }
  func.func @transform_1(%arg0: i32, %arg1: i32) -> (i32, i32, i32) {
    %c0_i32 = arith.constant 0 : i32
    %c0_i32_0 = arith.constant 0 : i32
    return %arg0, %c0_i32, %arg1 : i32, i32, i32
  }
  func.func @transform_2(%arg0: i32, %arg1: i32) -> (i32, i32) {
    %c0_i32 = arith.constant 0 : i32
    %c0_i32_0 = arith.constant 0 : i32
    %c0_i32_1 = arith.constant 0 : i32
    return %c0_i32, %c0_i32_0 : i32, i32
  }
  func.func @transform_3(%arg0: i32, %arg1: i32) -> (i32, i32) {
    %c0_i32 = arith.constant 0 : i32
    %c0_i32_0 = arith.constant 0 : i32
    %c0_i32_1 = arith.constant 0 : i32
    return %c0_i32, %c0_i32_0 : i32, i32
  }
  func.func @transform_4(%arg0: i32, %arg1: i32) -> (i32, i32) {
    %c0_i32 = arith.constant 0 : i32
    %c0_i32_0 = arith.constant 0 : i32
    %c0_i32_1 = arith.constant 0 : i32
    return %c0_i32, %c0_i32_0 : i32, i32
  }
  func.func @transform_5(%arg0: i32, %arg1: i32) -> (i32, i32, i32) {
    %c0_i32 = arith.constant 0 : i32
    %c0_i32_0 = arith.constant 0 : i32
    return %arg0, %c0_i32, %arg1 : i32, i32, i32
  }
}

</mosaic_0001>

<bundles_post_ra>
// kernel: tpu_custom_call.1
= control target key start
LH: loop header
LB: loop body
LE: loop exit
PB: predicated region body
PF: predicated region fallthrough
CT: control target
= control target key end

     0   :  { %s1380_s0 = inlined_call_operand.hbm [shape: f32[2,32,256], index: 0, kind: input, shape index: {}]   ;;  %s1381_s1 = inlined_call_operand.hbm [shape: f32[2,32,256], index: 1, kind: input, shape index: {}]   ;;  %s1382_s2 = inlined_call_operand.vmem [shape: f32[32,64], index: 2, kind: input, shape index: {}]   ;;  %s1383_s3 = inlined_call_operand.vmem [shape: f32[32,1], index: 3, kind: input, shape index: {}]   ;;  %s1384_s4 = inlined_call_operand.vmem [shape: f32[32,1], index: 4, kind: input, shape index: {}]   ;;  %s1385_s5 = inlined_call_operand.hbm [shape: f32[2,32,256], index: 5, kind: output, shape index: {}]  }
   0x1   :  { %1389 = sst [smem:[#allocation11_spill]] %s1380_s0 }
   0x2   :  { %10 = vsyncpa [#allocation3], 0 }
   0x3   :  { %12 = vsyncpa [#allocation3 + $0x1], 0 }
   0x4   :  { %13 = vsyncpa [#allocation6], 0 }
   0x5   :  { %15 = vsyncpa [#allocation6 + $0x1], 0 }
   0x6   :  { %16 = vsyncpa [#allocation4], 0 }
   0x7   :  { %18 = vsyncpa [#allocation4 + $0x1], 0  ;;  %s1030_s18 = smov 0   ;;  %s1032_s19 = smov 0  }
   0x8   :  { %s1034_s20 = smov 0   ;;  %s1036_s21 = smov 0  }
   0x9   :  { %s1038_s22 = smov 0   ;;  %s1040_s23 = smov 0  }
   0xa LB: > { %s714_s24 = sadd.s32 4294967295, %s989_s23   ;;  %s715_s25 = sadd.s32 4294967294, %s989_s23   ;;  %s989_s23 = sphi %s1040_s23, %s24_s23   ;;  %s985_s22 = sphi %s1038_s22, %s1407_s22   ;;  %s981_s21 = sphi %s1036_s21, %s1406_s21   ;;  %s977_s20 = sphi %s1034_s20, %s1405_s20   ;;  %s973_s19 = sphi %s1032_s19, %s1404_s19   ;;  %s969_s18 = sphi %s1030_s18, %s1403_s18  }
   0xb   : > { %s36_s26 = sadd.s32 1, %s985_s22  ;;  %s45_s27 = sadd.s32 1, %s977_s20 }
   0xc   : > { %p38_p0 = scmp.ge.s32.totalorder %s36_s26, 2  ;;  %p52_p1 = scmp.ne.s32.totalorder %s977_s20, %s973_s19 }
   0xd   : > { %p53_p2 = scmp.eq.s32.totalorder %s989_s23, 0  ;;  %p58_p3 = scmp.ne.s32.totalorder %s973_s19, %s969_s18 }
   0xe   : > { %s1409_s26 = smov (%p38_p0, %s36_s26), 0  ;;  %p59_p5 = scmp.eq.s32.totalorder %s714_s24, 0 }
   0xf   : > { %p1071_p4 = por %p53_p2, %p52_p1  ;;  %s40_s29 = ssub.s32 %s985_s22, %s1409_s26 }
  0x10   : > { %p175_p6 = scmp.eq.s32.totalorder %s714_s24, 1  ;;  %p43_p7 = scmp.eq.s32.totalorder %s40_s29, 0 }
  0x11   : > { %p1077_p8 = por %p59_p5, %p58_p3  ;;  %p181_p10 = scmp.eq.s32.totalorder %s715_s25, 1 }
  0x12   : > { %p1081_p9 = por %p175_p6, %p52_p1  ;;  %p781_p13 = scmp.lt.s32.totalorder %s989_s23, 2 }
  0x13   : > { %s1391_s30 = scalar_select %p1077_p8, 1, 0 }
  0x14   : > { %s1392_s6 = scalar_select %p1081_p9, 1, 0 }
  0x15   : > { %s1086_s7 = scalar_select %p43_p7, %s977_s20, %s45_s27  }
  0x16   : > { %p1088_p11 = por %p181_p10, %p58_p3  ;;  %s1095_s9 = sand.u32 1, %s977_s20  }
  0x17   : > { %s718_s10 = sshll.u32 %s1095_s9, 6  ;;  %s737_s11 = sshll.u32 %s985_s22, 10 }
  0x18   : > { %s1393_s8 = scalar_select %p1088_p11, 1, 0 }
  0x19   : > { %s1394_s0 = sld [smem:[#allocation11_spill]]  ;;  %s214_s15 = scalar_lea.vmem [#allocation2], %s718_s10 }
  0x1a   : > { %s223_s16 = sshll.u32 %s214_s15, 4  ;;  %p1112_p0 = pnand %p781_p13, %p1071_p4  ;;  %s1108_s16 = int_to_ptr.vmem [resolvable:$true] %s223_s16 }
  0x1b   : > { %s211_s24 = scalar_lea.sflag [#allocation3], %s1095_s9 }
  0x1c   : > { %p845_p3 = pneg %p1112_p0 }
  0x1f   : > { %s1104_s14 = scalar_lea.hbm %s1394_s0, %s737_s11  ;;  %s848_s28 = scalar_lea.hbm %s1394_s0, 2048 }
  0x20   : > { %s843_s25 = scalar_lea.hbm %s1104_s14, 1024  ;;  %p849_p4 = scmp.lt.u32.totalorder %s1104_s14, %s1394_s0 }
  0x21   : > { %p844_p2 = scmp.ne.s32.totalorder %s1104_s14, %s843_s25  ;;  %p850_p7 = scmp.lt.u32.totalorder %s848_s28, %s843_s25 }
  0x22   : > { %p852_p13 = scmp.lt.u32.totalorder %s843_s25, %s1104_s14 }
  0x23   : > { %p846_p5 = pnand %p845_p3, %p844_p2  ;;  %p851_p10 = por %p850_p7, %p849_p4 }
  0x25   : > { %p847_p6 = pneg %p846_p5  ;;  %p853_p12 = por %p852_p13, %p851_p10 }
  0x27   : > { %p854_p1 = pnand %p853_p12, %p847_p6 }
  0x29   : > { %857 = shalt.err (!%p854_p1)
}
  0x2a   : > { %s858_s15 = scalar_lea.vmem %s1108_s16, 1024  ;;  %s991_s27 = smov [#allocation2]  }
  0x2b   : > { %p859_p2 = scmp.ne.s32.totalorder %s1108_s16, %s858_s15  ;;  %s863_s29 = sshll.u32 %s991_s27, 4  ;;  %s864_s29 = int_to_ptr.vmem [resolvable:$false] %s863_s29 }
  0x2c   : > { %s865_s12 = scalar_lea.vmem %s864_s29, 2048  ;;  %p866_p9 = scmp.lt.s32.totalorder %s1108_s16, %s864_s29 }
  0x2d   : > { %p861_p5 = pnand %p859_p2, %p845_p3  ;;  %p867_p4 = scmp.lt.s32.totalorder %s865_s12, %s858_s15 }
  0x2f   : > { %p862_p11 = pneg %p861_p5  ;;  %p868_p7 = por %p867_p4, %p866_p9 }
  0x31   : > { %p869_p10 = pnand %p868_p7, %p862_p11 }
  0x33   : > { %872 = shalt.err (!%p869_p10)
}
  0x34   : > { %s1387_s25 = smov 256   ;;  %s993_s28 = smov 16  }
  0x35   : > { %773 = dma.hbm_to_vmem [thread:$0]  (!%p1112_p0), %s1104_s14, 1024, %s1108_s16, %s211_s24, %s1387_s25, %s1387_s25, %s993_s28  }
  0x36   : > { %p254_p9 = scmp.lt.s32.totalorder %s989_s23, 3  ;;  %s1154_s27 = scalar_lea.hbm %s1381_s1, %s737_s11 }
  0x37   : > { %p1396_p11 = scmp.ge.s32.totalorder %s989_s23, 1  ;;  %s237_s12 = scalar_lea.vmem [#allocation5], %s718_s10 }
  0x38   : > { %s246_s0 = sshll.u32 %s237_s12, 4  ;;  %s234_s14 = scalar_lea.sflag [#allocation6], %s1095_s9  ;;  %s1164_s0 = int_to_ptr.vmem [resolvable:$true] %s246_s0 }
  0x39   : > { %p1158_p12 = pnand %p1396_p11, %p254_p9  ;;  %s873_s16 = scalar_lea.hbm %s1154_s27, 1024 }
  0x3a   : > { %p874_p1 = scmp.ne.s32.totalorder %s1154_s27, %s873_s16  ;;  %s878_s13 = scalar_lea.hbm %s1381_s1, 2048 }
  0x3b   : > { %p879_p2 = scmp.lt.u32.totalorder %s1154_s27, %s1381_s1  ;;  %p880_p5 = scmp.lt.u32.totalorder %s878_s13, %s873_s16 }
  0x3c   : > { %p876_p6 = pnand %p874_p1, %p845_p3  ;;  %p882_p7 = scmp.lt.u32.totalorder %s873_s16, %s1154_s27 }
  0x3d   : > { %p881_p4 = por %p880_p5, %p879_p2 }
  0x3e   : > { %p877_p13 = pneg %p876_p6 }
  0x3f   : > { %p883_p10 = por %p882_p7, %p881_p4 }
  0x41   : > { %p884_p9 = pnand %p883_p10, %p877_p13 }
  0x43   : > { %887 = shalt.err (!%p884_p9)
}
  0x44   : > { %s888_s10 = scalar_lea.vmem %s1164_s0, 1024  ;;  %s994_s12 = smov [#allocation5]  }
  0x45   : > { %p889_p11 = scmp.ne.s32.totalorder %s1164_s0, %s888_s10  ;;  %s893_s11 = sshll.u32 %s994_s12, 4  ;;  %s894_s11 = int_to_ptr.vmem [resolvable:$false] %s893_s11 }
  0x46   : > { %s895_s25 = scalar_lea.vmem %s894_s11, 2048  ;;  %p896_p8 = scmp.lt.s32.totalorder %s1164_s0, %s894_s11 }
  0x47   : > { %p891_p1 = pnand %p889_p11, %p845_p3  ;;  %p897_p2 = scmp.lt.s32.totalorder %s895_s25, %s888_s10 }
  0x49   : > { %p892_p6 = pneg %p891_p1  ;;  %p898_p5 = por %p897_p2, %p896_p8 }
  0x4b   : > { %p899_p4 = pnand %p898_p5, %p892_p6 }
  0x4d   : > { %902 = shalt.err (!%p899_p4)
}
  0x4e   : > { %s1398_s16 = smov 256   ;;  %258 = sbr.rel (%p1158_p12) target bundleno = 388 (0x184), region = 40 }
  0x4f   : > { %776 = dma.hbm_to_vmem [thread:$0]  (!%p1112_p0), %s1154_s27, 1024, %s1164_s0, %s234_s14, %s1398_s16, %s1398_s16, %s993_s28  }
  0x50   : > { %s1198_s24 = sand.u32 (!%p1158_p12), 1, %s973_s19   ;;  %p1399_p8 = scmp.ne.s32.totalorder (!%p1158_p12), %s1391_s30, 0 }
  0x51   : > { %s1201_s13 = sshll.u32 (!%p1158_p12), %s1198_s24, 6  ;;  %s261_s17 = scalar_lea.sflag (!%p1158_p12), [#allocation3], %s1198_s24 }
  0x52   : > { %s264_s15 = scalar_lea.vmem (!%p1158_p12), [#allocation2], %s1201_s13 }
  0x55   : > { %956 = dma.done.wait (%p1399_p8), %s261_s17, 1024  }
  0x56   : > { %958 = vsyncadd (%p1399_p8), %s261_s17, 4294966272  ;;  %s270_s0 = scalar_lea.sflag [#allocation6], %s1198_s24  ;;  %s1211_s9 = scalar_lea.vmem [#allocation5], %s1201_s13 }
  0x57   : > { %960 = dma.done.wait (%p1399_p8), %s270_s0, 1024  }
  0x58   : > { %962 = vsyncadd (%p1399_p8), %s270_s0, 4294966272  ;;  %v995_v0 = vmov 0.0   ;;  %v996_v1 = vmov 0   ;;  %v309_v2 = vld [vmem:[%s264_s15 + $0x8] sm:$0xff]  ;;  %v311_v3 = vld [vmem:[%s264_s15 + $0x18] sm:$0xff]  ;;  %vm328_vm0 = vcmask 523264  }
  0x59   : > { %405 = vmatprep.mubr.f32.mxu0 %v995_v0  ;;  %417 = vmatprep.mubr.f32.mxu1 %v995_v0  ;;  %v308_v4 = vld [vmem:[%s264_s15] sm:$0xff]  ;;  %v740_v5 = vpack.c.bf16 %v311_v3, %v309_v2  ;;  %v310_v6 = vld [vmem:[%s264_s15 + $0x10] sm:$0xff]  ;;  %v313_v7 = vld [vmem:[%s264_s15 + $0x28] sm:$0xff]  ;;  %s1314_s17 = scalar_lea.vmem [#allocation7], %s1201_s13  ;;  %s739_s0 = sshll.u32 %s981_s21, 10 }
  0x5a   : > { %838 = vset.pattern.permute.xlu1 %v996_v1  ;;  %837 = vset.pattern.permute.xlu0 %v996_v1  ;;  %v315_v8 = vld [vmem:[%s264_s15 + $0x38] sm:$0xff]  ;;  %v742_v9 = vpack.c.bf16 %v310_v6, %v308_v4  ;;  %v312_v11 = vld [vmem:[%s264_s15 + $0x20] sm:$0xff]  ;;  %v314_v12 = vld [vmem:[%s264_s15 + $0x30] sm:$0xff]  ;;  %s601_s15 = sshll.u32 %s1314_s17, 4  ;;  %s586_s30 = scalar_lea.sflag [#allocation4], %s1198_s24  ;;  %s1318_s15 = int_to_ptr.vmem [resolvable:$true] %s601_s15 }
  0x5b   : > { %v744_v10 = vpack.c.bf16 %v315_v8, %v313_v7  ;;  %v317_v13 = vld [vmem:[%s1211_s9 + $0x8] sm:$0xff]  ;;  %741 = vmatprep.subr.bf16.mxu0 %v740_v5  ;;  %756 = vmatprep.subr.bf16.mxu1 %v740_v5  ;;  %v319_v14 = vld [vmem:[%s1211_s9 + $0x18] sm:$0xff]  ;;  %v746_v15 = vpack.c.bf16 %v314_v12, %v312_v11  ;;  %v316_v17 = vld [vmem:[%s1211_s9] sm:$0xff]  ;;  %s903_s28 = scalar_lea.vmem %s1318_s15, 1024  ;;  %p1400_p3 = scmp.ne.s32.totalorder %s1392_s6, 0 }
  0x5c   : > { %743 = vmatpush1.bf16.msra.mxu0 %v742_v9  ;;  %760 = vmatpush1.bf16.msra.mxu1 %v742_v9  ;;  %v748_v16 = vpack.c.bf16 %v319_v14, %v317_v13  ;;  %v318_v18 = vld [vmem:[%s1211_s9 + $0x10] sm:$0xff]  ;;  %v321_v19 = vld [vmem:[%s1211_s9 + $0x28] sm:$0xff]  ;;  %v323_v20 = vld [vmem:[%s1211_s9 + $0x38] sm:$0xff]  ;;  %p904_p0 = scmp.ne.s32.totalorder %s1318_s15, %s903_s28  ;;  %s997_s27 = smov [#allocation7]  }
  0x5d   : > { %745 = vmatprep.subr.bf16.mxu0 %v744_v10  ;;  %757 = vmatprep.subr.bf16.mxu1 %v744_v10  ;;  %v515_v21 = vld [vmem:[%s1383_s3 + $0x10] sm:$0xff]  ;;  %v513_v22 = vld [vmem:[%s1383_s3] sm:$0xff]  ;;  %v750_v23 = vpack.c.bf16 %v318_v18, %v316_v17  ;;  %v516_v24 = vld [vmem:[%s1383_s3 + $0x18] sm:$0xff]  ;;  %v752_v25 = vpack.c.bf16 %v323_v20, %v321_v19  ;;  %s907_s29 = sshll.u32 %s997_s27, 4  ;;  %s908_s29 = int_to_ptr.vmem [resolvable:$false] %s907_s29 }
  0x5e   : > { %529 = vperm.xlu1 %838, %v515_v21   ;;  %v320_v26 = vld [vmem:[%s1211_s9 + $0x20] sm:$0xff]  ;;  %v322_v27 = vld [vmem:[%s1211_s9 + $0x30] sm:$0xff]  ;;  %519 = vperm.xlu0 %837, %v513_v22   ;;  %v514_v28 = vld [vmem:[%s1383_s3 + $0x8] sm:$0xff]  ;;  %s1323_s9 = scalar_lea.hbm %s1385_s5, %s739_s0  ;;  %p905_p12 = pnand %p904_p0, %p1400_p3 }
  0x5f   : > { %v754_v29 = vpack.c.bf16 %v322_v27, %v320_v26  ;;  %v546_v30 = vld [vmem:[%s1384_s4 + $0x8] sm:$0xff]  ;;  %v545_v31 = vld [vmem:[%s1384_s4] sm:$0xff]  ;;  %v326_v33 = vld [vmem:[%s1382_s2 + $0x10] sm:$0xff]  ;;  %s909_s14 = scalar_lea.vmem %s908_s29, 2048  ;;  %p910_p7 = scmp.lt.s32.totalorder %s1318_s15, %s908_s29 }
  0x60   : > { %747 = vmatpush1.bf16.msra.mxu0 %v746_v15  ;;  %761 = vmatpush1.bf16.msra.mxu1 %v746_v15  ;;  %v324_v32 = vld [vmem:[%s1382_s2] sm:$0xff]  ;;  %v548_v34 = vld [vmem:[%s1384_s4 + $0x18] sm:$0xff]  ;;  %v547_v35 = vld [vmem:[%s1384_s4 + $0x10] sm:$0xff]  ;;  %p906_p13 = pneg %p905_p12  ;;  %p911_p10 = scmp.lt.s32.totalorder %s909_s14, %s903_s28 }
  0x61   : > { %749 = vmatprep.subr.bf16.mxu0 %v748_v16  ;;  %758 = vmatprep.subr.bf16.mxu1 %v748_v16  ;;  %v325_v36 = vld [vmem:[%s1382_s2 + $0x8] sm:$0xff]  ;;  %v327_v37 = vld [vmem:[%s1382_s2 + $0x18] sm:$0xff] }
  0x62   : > { %534 = vperm.xlu1 %838, %v516_v24   ;;  %524 = vperm.xlu0 %837, %v514_v28   ;;  %p912_p9 = por %p911_p10, %p910_p7 }
  0x64   : > { %751 = vmatpush1.bf16.msra.mxu0 %v750_v23  ;;  %762 = vmatpush1.bf16.msra.mxu1 %v750_v23  ;;  %p913_p11 = pnand %p912_p9, %p906_p13 }
  0x65   : > { %753 = vmatprep.subr.bf16.mxu0 %v752_v25  ;;  %759 = vmatprep.subr.bf16.mxu1 %v752_v25 }
  0x66   : > { %556 = vperm.xlu1 %838, %v546_v30   ;;  %551 = vperm.xlu0 %837, %v545_v31  }
  0x68   : > { %755 = vmatpush1.bf16.msra.mxu0 %v754_v29  ;;  %763 = vmatpush1.bf16.msra.mxu1 %v754_v29 }
  0x6a   : > { %566 = vperm.xlu1 %838, %v548_v34   ;;  %561 = vperm.xlu0 %837, %v547_v35  }
  0x6b   : > { %728 = vmatmul.mubr.msk.f32.vlgmr.msra.gmra.mrb[0].mxu0 %vm328_vm0, %v324_v32  ;;  %730 = vmatmul.mubr.msk.f32.vlgmr.msra.gmra.mrb[0].mxu1 %vm328_vm0, %v326_v33 }
  0x6c   : > { %411 = vmatprep.mubr.f32.mxu0 %v995_v0  ;;  %423 = vmatprep.mubr.f32.mxu1 %v995_v0 }
  0x6f   : > { %729 = vmatmul.mubr.msk.f32.gmra.mrb[2].mxu0 %vm328_vm0, %v325_v36  ;;  %731 = vmatmul.mubr.msk.f32.gmra.mrb[2].mxu1 %vm328_vm0, %v327_v37 }
 0x13e   : > { %v407_v38 = vpop.f32.mrb[0].mxu0  ;;  %v419_v39 = vpop.f32.mrb[0].mxu1 }
 0x13f   : > { %v409_v40 = vpop.f32.mrb[1].mxu0  ;;  %v421_v41 = vpop.f32.mrb[1].mxu1  ;;  %v1265_v42 = vmax.f32 %v407_v38, 0.0  ;;  %v1269_v46 = vmax.f32 %v419_v39, 0.0 }
 0x140   : > { %v1267_v43 = vmax.f32 %v409_v40, 0.0  ;;  %v1275_v51 = vmax.f32 %v421_v41, 0.0 }
 0x141   : > { %v459_v54 = vmul.f32 %v1265_v42, %v1265_v42  ;;  %v463_v60 = vmul.f32 %v1269_v46, %v1269_v46 }
 0x142   : > { %v413_v44 = vpop.f32.mrb[2].mxu0  ;;  %v425_v45 = vpop.f32.mrb[2].mxu1  ;;  %v460_v57 = vmul.f32 %v1267_v43, %v1267_v43  ;;  %v464_v0 = vmul.f32 %v1275_v51, %v1275_v51 }
 0x143   : > { %v1271_v47 = vmax.f32 %v413_v44, 0.0  ;;  %v415_v48 = vpop.f32.mrb[3].mxu0  ;;  %v1273_v49 = vmax.f32 %v425_v45, 0.0  ;;  %v427_v50 = vpop.f32.mrb[3].mxu1 }
 0x144   : > { %v1277_v52 = vmax.f32 %v415_v48, 0.0  ;;  %v1279_v53 = vmax.f32 %v427_v50, 0.0 }
 0x145   : > { %v438_v55 = vadd.f32 %v1271_v47, %v1265_v42  ;;  %v461_v56 = vmul.f32 %v1271_v47, %v1271_v47  ;;  %v465_v63 = vmul.f32 %v1273_v49, %v1273_v49 }
 0x146   : > { %v447_v58 = vadd.f32 %v1277_v52, %v1267_v43  ;;  %v462_v59 = vmul.f32 %v1277_v52, %v1277_v52  ;;  %v466_v3 = vmul.f32 %v1279_v53, %v1279_v53 }
 0x147   : > { %v467_v61 = vadd.f32 %v461_v56, %v459_v54  ;;  %v439_v62 = vadd.f32 %v438_v55, %v1269_v46 }
 0x148   : > { %v476_v1 = vadd.f32 %v462_v59, %v460_v57  ;;  %v448_v2 = vadd.f32 %v447_v58, %v1275_v51  ;;  %v520_v59 = vpop.permute.xlu0 %519 }
 0x149   : > { %v440_v4 = vadd.f32 %v439_v62, %v1273_v49  ;;  %v468_v5 = vadd.f32 %v467_v61, %v463_v60 }
 0x14a   : > { %v449_v6 = vadd.f32 %v448_v2, %v1279_v53  ;;  %v477_v7 = vadd.f32 %v476_v1, %v464_v0 }
 0x14b   : > { %v441_v8 = vrot.slane %v440_v4, 4  ;;  %v469_v9 = vadd.f32 %v468_v5, %v465_v63 }
 0x14c   : > { %v450_v10 = vrot.slane %v449_v6, 4  ;;  %v478_v11 = vadd.f32 %v477_v7, %v466_v3 }
 0x14d   : > { %v442_v12 = vadd.f32 %v441_v8, %v440_v4  ;;  %v470_v13 = vrot.slane %v469_v9, 4 }
 0x14e   : > { %v451_v14 = vadd.f32 %v450_v10, %v449_v6  ;;  %v479_v15 = vrot.slane %v478_v11, 4 }
 0x14f   : > { %v443_v16 = vrot.slane %v442_v12, 2  ;;  %v471_v17 = vadd.f32 %v470_v13, %v469_v9 }
 0x150   : > { %v452_v18 = vrot.slane %v451_v14, 2  ;;  %v480_v19 = vadd.f32 %v479_v15, %v478_v11 }
 0x151   : > { %v444_v20 = vadd.f32 %v443_v16, %v442_v12  ;;  %v472_v21 = vrot.slane %v471_v17, 2 }
 0x152   : > { %v453_v22 = vadd.f32 %v452_v18, %v451_v14  ;;  %v481_v23 = vrot.slane %v480_v19, 2 }
 0x153   : > { %v445_v24 = vrot.slane %v444_v20, 1  ;;  %v473_v25 = vadd.f32 %v472_v21, %v471_v17 }
 0x154   : > { %v454_v26 = vrot.slane %v453_v22, 1  ;;  %v482_v27 = vadd.f32 %v481_v23, %v480_v19 }
 0x155   : > { %v446_v28 = vadd.f32 %v445_v24, %v444_v20  ;;  %v474_v29 = vrot.slane %v473_v25, 1 }
 0x156   : > { %v455_v30 = vadd.f32 %v454_v26, %v453_v22  ;;  %v483_v31 = vrot.slane %v482_v27, 1 }
 0x157   : > { %v457_v32 = vmul.f32 0.03125, %v446_v28  ;;  %v475_v33 = vadd.f32 %v474_v29, %v473_v25 }
 0x158   : > { %v458_v34 = vmul.f32 0.03125, %v455_v30  ;;  %v484_v35 = vadd.f32 %v483_v31, %v482_v27 }
 0x159   : > { %v485_v36 = vmul.f32 0.03125, %v475_v33  ;;  %v487_v37 = vmul.f32 %v457_v32, %v457_v32  ;;  %v503_v38 = vsub.f32 %v1273_v49, %v457_v32  ;;  %v501_v39 = vsub.f32 %v1269_v46, %v457_v32  ;;  %v530_v49 = vpop.permute.xlu1 %529 }
 0x15a   : > { %v486_v40 = vmul.f32 0.03125, %v484_v35  ;;  %v488_v41 = vmul.f32 %v458_v34, %v458_v34  ;;  %v504_v44 = vsub.f32 %v1279_v53, %v458_v34  ;;  %v502_v45 = vsub.f32 %v1275_v51, %v458_v34  ;;  %v525_v53 = vpop.permute.xlu0 %524 }
 0x15b   : > { %v489_v48 = vsub.f32 %v485_v36, %v487_v37  ;;  %v497_v50 = vsub.f32 %v1265_v42, %v457_v32  ;;  %v498_v54 = vsub.f32 %v1267_v43, %v458_v34  ;;  %v499_v55 = vsub.f32 %v1271_v47, %v457_v32 }
 0x15c   : > { %v490_v56 = vsub.f32 %v486_v40, %v488_v41  ;;  %v500_v57 = vsub.f32 %v1277_v52, %v458_v34 }
 0x15d   : > { %v491_v58 = vmax.f32 %v489_v48, 0.0  ;;  %v535_v51 = vpop.permute.xlu1 %534 }
 0x15e   : > { %v492_v46 = vmax.f32 %v490_v56, 0.0  ;;  %v552_v62 = vpop.permute.xlu0 %551 }
 0x15f   : > { %v493_v60 = vadd.f32 1e-05, %v491_v58 }
 0x160   : > { %v494_v61 = vadd.f32 1e-05, %v492_v46 }
 0x161   : > { %839 = vrsqrt.f32 %v493_v60  ;;  %v557_v42 = vpop.permute.xlu1 %556 }
 0x162   : > { %841 = vrsqrt.f32 %v494_v61  ;;  %v562_v15 = vpop.permute.xlu0 %561 }
 0x165   : > { %v567_v14 = vpop.permute.xlu1 %566 }
 0x16b   : > { %v840_v43 = vpop.eup %839 }
 0x16c   : > { %v842_v63 = vpop.eup %841  ;;  %v509_v47 = vmul.f32 %v840_v43, %v501_v39  ;;  %v505_v0 = vmul.f32 %v840_v43, %v497_v50  ;;  %v511_v1 = vmul.f32 %v840_v43, %v503_v38  ;;  %v507_v52 = vmul.f32 %v840_v43, %v499_v55 }
 0x16d   : > { %v510_v2 = vmul.f32 %v842_v63, %v502_v45  ;;  %v506_v3 = vmul.f32 %v842_v63, %v498_v54  ;;  %v512_v4 = vmul.f32 %v842_v63, %v504_v44  ;;  %v508_v5 = vmul.f32 %v842_v63, %v500_v57 }
 0x16e   : > { %v541_v6 = vmul.f32 %v530_v49, %v509_v47  ;;  %v537_v7 = vmul.f32 %v520_v59, %v505_v0  ;;  %v543_v8 = vmul.f32 %v535_v51, %v511_v1  ;;  %v539_v9 = vmul.f32 %v525_v53, %v507_v52 }
 0x16f   : > { %v542_v10 = vmul.f32 %v530_v49, %v510_v2  ;;  %v538_v11 = vmul.f32 %v520_v59, %v506_v3  ;;  %v544_v12 = vmul.f32 %v535_v51, %v512_v4  ;;  %v540_v13 = vmul.f32 %v525_v53, %v508_v5 }
 0x170   : > { %v571_v16 = vadd.f32 %v557_v42, %v539_v9  ;;  %v569_v17 = vadd.f32 %v552_v62, %v537_v7  ;;  %v575_v18 = vadd.f32 %v567_v14, %v543_v8  ;;  %v573_v19 = vadd.f32 %v562_v15, %v541_v6 }
 0x171   : > { %v572_v20 = vadd.f32 %v557_v42, %v540_v13  ;;  %v570_v21 = vadd.f32 %v552_v62, %v538_v11  ;;  %v576_v22 = vadd.f32 %v567_v14, %v544_v12  ;;  %v574_v23 = vadd.f32 %v562_v15, %v542_v10 }
 0x172   : > { %579 = vst [vmem:[%s1314_s17 + $0x10] sm:$0xff] %v571_v16  ;;  %577 = vst [vmem:[%s1314_s17] sm:$0xff] %v569_v17 }
 0x173   : > { %583 = vst [vmem:[%s1314_s17 + $0x30] sm:$0xff] %v575_v18  ;;  %581 = vst [vmem:[%s1314_s17 + $0x20] sm:$0xff] %v573_v19 }
 0x174   : > { %580 = vst [vmem:[%s1314_s17 + $0x18] sm:$0xff] %v572_v20  ;;  %578 = vst [vmem:[%s1314_s17 + $0x8] sm:$0xff] %v570_v21 }
 0x175   : > { %584 = vst [vmem:[%s1314_s17 + $0x38] sm:$0xff] %v576_v22  ;;  %582 = vst [vmem:[%s1314_s17 + $0x28] sm:$0xff] %v574_v23 }
 0x176   : > { %916 = shalt.err (!%p913_p11)
}
 0x177   : > { %s917_s10 = scalar_lea.hbm %s1323_s9, 1024  ;;  %s921_s25 = scalar_lea.hbm %s1385_s5, 2048 }
 0x178   : > { %p918_p1 = scmp.ne.s32.totalorder %s1323_s9, %s917_s10  ;;  %p922_p5 = scmp.lt.u32.totalorder %s1323_s9, %s1385_s5 }
 0x179   : > { %p923_p4 = scmp.lt.u32.totalorder %s921_s25, %s917_s10  ;;  %p925_p0 = scmp.lt.u32.totalorder %s917_s10, %s1323_s9 }
 0x17a   : > { %p919_p6 = pnand %p918_p1, %p1400_p3 }
 0x17b   : > { %p924_p8 = por %p923_p4, %p922_p5 }
 0x17c   : > { %p920_p2 = pneg %p919_p6 }
 0x17d   : > { %p926_p12 = por %p925_p0, %p924_p8 }
 0x17f   : > { %p927_p13 = pnand %p926_p12, %p920_p2 }
 0x181   : > { %930 = shalt.err (!%p927_p13)
}
 0x182   : > { %s998_s0 = smov 256   ;;  %s999_s21 = smov 16  }
 0x183   : > { %768 = dma.vmem_to_hbm [thread:$0]  (%p1400_p3), %s1318_s15, 1024, %s1323_s9, %s586_s30, %s998_s0, %s998_s0, %s999_s21  }
 0x184 PF: > { %s616_s13 = sand.u32 1, %s969_s18   ;;  %p1401_p7 = scmp.ne.s32.totalorder %s1393_s8, 0 }
 0x185   : > { %p1402_p10 = scmp.ge.s32.totalorder %s989_s23, 2  ;;  %s617_s28 = scalar_lea.sflag [#allocation4], %s616_s13 }
 0x187   : > { %p778_p9 = pnand %p1402_p10, %p1401_p7 }
 0x189   : > { %964 = dma.done.wait (!%p778_p9), %s617_s28, 1024  }
 0x18a   : > { %966 = vsyncadd (!%p778_p9), %s617_s28, 4294966272  ;;  %s24_s23 = sadd.s32 1, %s989_s23   ;;  %s1403_s18 = smov %s973_s19 }
 0x18b   : > { %p21_p11 = scmp.ge.s32.totalorder %s24_s23, 4   ;;  %s1404_s19 = smov %s977_s20 }
 0x18c   : > { %s1405_s20 = smov %s1086_s7  ;;  %s1406_s21 = smov %s985_s22 }
 0x18d   : > { %s1407_s22 = smov %s1409_s26  ;;  %23 = sbr.rel (!%p21_p11) target bundleno = 10 (0xa), region = 98 }
 0x194   :  { %622 = vsyncpa [#allocation3], 1 }
 0x195   :  { %624 = vsyncpa [#allocation3 + $0x1], 1 }
 0x196   :  { %625 = vsyncpa [#allocation6], 1 }
 0x197   :  { %627 = vsyncpa [#allocation6 + $0x1], 1 }
 0x198   :  { %628 = vsyncpa [#allocation4], 1 }
 0x199   :  { %630 = vsyncpa [#allocation4 + $0x1], 1 }

</bundles_post_ra>
